<compile_context>
chip_gen: v5e
topology: v5e:2x2
jax: 0.10.0
libtpu: 0.0.40
codegen_flags: <defaults>
</compile_context>

<pallas_src>
import functools

import jax
import jax.numpy as jnp
import numpy as np
from jax import lax
from jax.experimental import pallas as pl
from jax.experimental.pallas import tpu as pltpu


def _round_up(x: int, m: int) -> int:
    return ((x + m - 1) // m) * m


def _cdiv(a: int, b: int) -> int:
    return -(-a // b)


def _choose_tile(dim: int, tile_max: int, align: int) -> int:
    """Least-padding tile <= tile_max, multiple of `align`.

    Uses the minimal block count a tile <= tile_max allows, then shrinks the
    tile to the smallest aligned size that still covers `dim` in that many
    blocks, so total padding stays close to the (8, 128) alignment minimum.
    """
    da = _round_up(dim, align)
    tile_max = max(align, (tile_max // align) * align)
    if da <= tile_max:
        return da
    nb = _cdiv(da, tile_max)
    return min(tile_max, _round_up(_cdiv(da, nb), align))


def _vmem_capacity_bytes() -> int:
    try:
        return int(pltpu.get_tpu_info().vmem_capacity_bytes)
    except Exception:
        return 64 * 1024 * 1024  # conservative fallback (v7x: 64 MiB per TC)


def _tile_vmem_bytes(tm, tn, tk, in_bytes, out_bytes, has_bias, multi_k):
    b = 2 * (tm * tk + tn * tk) * in_bytes   # double-buffered x / weight tiles
    b += 2 * tm * tn * out_bytes             # double-buffered output tile
    if multi_k:
        b += tm * tn * 4                     # f32 accumulator scratch
    if has_bias:
        b += 2 * tn * 4                      # bias tile (f32)
    return b


# ---------------- Pallas kernel factory ----------------

@functools.lru_cache(maxsize=None)
def _make_kernel(has_bias: bool, multi_k: bool, square_weight: bool,
                 compute_dtype_name):
    compute_dtype = (None if compute_dtype_name is None
                     else jnp.dtype(compute_dtype_name))

    def _compute(x_ref, w_ref, b_ref, o_ref, acc_ref):
        w = w_ref[...]
        # Positivity constraint: square the log-weights on the VPU. With large
        # tm this is amortized over many MXU rows per k-step. (Callers with a
        # frozen, pre-squared weight can pass square_weight=False.)
        w2 = w * w if square_weight else w
        x = x_ref[...]
        if compute_dtype is not None:
            x = x.astype(compute_dtype)
            w2 = w2.astype(compute_dtype)
        # NT contraction: contract the shared in_features axis directly on the
        # MXU (no transpose of the (tn, tk) weight tile), f32 accumulation.
        part = lax.dot_general(
            x, w2,
            dimension_numbers=(((1,), (1,)), ((), ())),
            preferred_element_type=jnp.float32)

        def _finish(y):
            if has_bias:
                y = y + b_ref[...].astype(jnp.float32)  # (1, tn) broadcast
            o_ref[...] = y.astype(o_ref.dtype)

        if not multi_k:
            # Single-K fast path: no accumulator read-modify-write at all.
            _finish(part)
        else:
            # P3 resident-accumulator pattern; REQUIRES the K grid axis to be
            # the last axis and marked "arbitrary" (guaranteed by the wrapper).
            k = pl.program_id(2)

            @pl.when(k == 0)
            def _init():
                acc_ref[...] = jnp.zeros_like(acc_ref)

            acc_ref[...] += part

            @pl.when(k == pl.num_programs(2) - 1)
            def _finalize():
                _finish(acc_ref[...])

    # Positional signatures matching pallas_call ref ordering.
    if has_bias and multi_k:
        def kernel(x_ref, w_ref, b_ref, o_ref, acc_ref):
            _compute(x_ref, w_ref, b_ref, o_ref, acc_ref)
    elif has_bias:
        def kernel(x_ref, w_ref, b_ref, o_ref):
            _compute(x_ref, w_ref, b_ref, o_ref, None)
    elif multi_k:
        def kernel(x_ref, w_ref, o_ref, acc_ref):
            _compute(x_ref, w_ref, None, o_ref, acc_ref)
    else:
        def kernel(x_ref, w_ref, o_ref):
            _compute(x_ref, w_ref, None, o_ref, None)
    return kernel


# ---------------- Wrapper ----------------

@functools.partial(jax.jit, static_argnames=("tm", "tn", "tk", "compute_dtype",
                                              "square_weight"))
def positive_linear(x, log_weight, bias=None, *, tm=512, tn=512, tk=2048,
                    compute_dtype=None, square_weight=True):
    """x: (..., in), log_weight: (out, in), bias: (out,) or None -> (..., out)."""
    orig_shape = x.shape
    if x.ndim != 2:
        x = x.reshape(-1, orig_shape[-1])

    B, K = x.shape
    N, K2 = log_weight.shape
    assert K == K2, "in_features mismatch"
    out_dtype = x.dtype
    log_weight = log_weight.astype(x.dtype)
    has_bias = bias is not None

    in_bytes = x.dtype.itemsize
    out_bytes = jnp.dtype(out_dtype).itemsize

    # --- tile selection: minimize padding, keep (8, 128) alignment ---
    tm_c = _choose_tile(B, tm, 8)
    tn_c = _choose_tile(N, tn, 128)
    tk_c = _choose_tile(K, tk, 128)

    # Fit the double-buffered working set into the per-generation VMEM budget.
    vmem_cap = _vmem_capacity_bytes()
    budget = int(0.7 * vmem_cap)
    while _tile_vmem_bytes(tm_c, tn_c, tk_c, in_bytes, out_bytes,
                           has_bias, True) > budget:
        if tk_c > 512:
            tk_c = _choose_tile(K, tk_c // 2, 128)
        elif tn_c > 128:
            tn_c = _choose_tile(N, tn_c // 2, 128)
        elif tm_c > 8:
            tm_c = _choose_tile(B, tm_c // 2, 8)
        else:
            break

    # Megacore (v7x has 2 TensorCores): if the parallel (M, N) grid has only
    # one block, split a tile when alignment allows it without extra padding.
    if _cdiv(B, tm_c) * _cdiv(N, tn_c) == 1:
        if tm_c % 16 == 0:
            tm_c //= 2
        elif tn_c % 256 == 0:
            tn_c //= 2

    Mp = _cdiv(B, tm_c) * tm_c
    Np = _cdiv(N, tn_c) * tn_c
    Kp = _cdiv(K, tk_c) * tk_c
    nk = Kp // tk_c
    multi_k = nk > 1

    # Zero padding is exact: padded log-weights square to zero and contribute
    # nothing along K; padded M/N rows/cols land only in output rows/cols that
    # are sliced off below.
    if (Mp, Kp) != (B, K):
        x = jnp.pad(x, ((0, Mp - B), (0, Kp - K)))
    if (Np, Kp) != (N, K):
        log_weight = jnp.pad(log_weight, ((0, Np - N), (0, Kp - K)))

    operands = [x, log_weight]
    in_specs = [
        pl.BlockSpec((tm_c, tk_c), lambda i, j, k: (i, k)),   # x tile
        pl.BlockSpec((tn_c, tk_c), lambda i, j, k: (j, k)),   # weight tile
    ]
    if has_bias:
        bias2d = bias.astype(jnp.float32).reshape(1, N)
        if Np != N:
            bias2d = jnp.pad(bias2d, ((0, 0), (0, Np - N)))
        operands.append(bias2d)
        in_specs.append(pl.BlockSpec((1, tn_c), lambda i, j, k: (0, j)))

    # Guard: K (reduction) axis is LAST and "arbitrary" -- required for the
    # resident-accumulator / write-once epilogue pattern.
    grid = (Mp // tm_c, Np // tn_c, nk)
    scratch = [pltpu.VMEM((tm_c, tn_c), jnp.float32)] if multi_k else []

    est = _tile_vmem_bytes(tm_c, tn_c, tk_c, in_bytes, out_bytes,
                           has_bias, multi_k)
    vmem_limit = int(min(max(16 * 1024 * 1024, 2 * est + 4 * 1024 * 1024),
                         0.75 * vmem_cap))

    cd_name = None if compute_dtype is None else jnp.dtype(compute_dtype).name
    kernel = _make_kernel(has_bias, multi_k, bool(square_weight), cd_name)

    out = pl.pallas_call(
        kernel,
        out_shape=jax.ShapeDtypeStruct((Mp, Np), out_dtype),
        grid_spec=pltpu.PrefetchScalarGridSpec(
            num_scalar_prefetch=0,
            grid=grid,
            in_specs=in_specs,
            out_specs=pl.BlockSpec((tm_c, tn_c), lambda i, j, k: (i, j)),
            scratch_shapes=scratch,
        ),
        compiler_params=pltpu.CompilerParams(
            dimension_semantics=("parallel", "parallel", "arbitrary"),
            vmem_limit_bytes=vmem_limit,
        ),
    )(*operands)

    out = out[:B, :N]
    if len(orig_shape) != 2:
        out = out.reshape(*orig_shape[:-1], N)
    return out


# ------------- Deterministic parameter init (mirrors reset_parameters) -------------

def init_positive_linear_params(key, in_features, out_features, use_bias=False):
    kw, kb = jax.random.split(key)
    # xavier_uniform_ on (out, in): bound = sqrt(6 / (fan_in + fan_out))
    limit = np.sqrt(6.0 / (in_features + out_features))
    w = jax.random.uniform(kw, (out_features, in_features),
                           minval=-limit, maxval=limit, dtype=jnp.float32)
    bias = None
    if use_bias:
        bound = np.sqrt(1.0 / np.sqrt(in_features))
        bias = jax.random.uniform(kb, (out_features,),
                                  minval=-bound, maxval=bound, dtype=jnp.float32)
    # log_weight.data.abs_().sqrt_()
    log_weight = jnp.sqrt(jnp.abs(w))
    return log_weight, bias


if __name__ == "__main__":
    key = jax.random.PRNGKey(0)
    k_x, k_p, k_x2, k_p2, k_x3 = jax.random.split(key, 5)

    # ---- Small shapes consistent with the module (single-tile, single-K) ----
    batch, in_features, out_features = 8, 32, 16
    x = jax.random.normal(k_x, (batch, in_features), dtype=jnp.float32)

    # Default module config: bias=False  (no-bias specialized kernel)
    log_weight, bias = init_positive_linear_params(
        k_p, in_features, out_features, use_bias=False)
    y = positive_linear(x, log_weight, bias)
    jax.block_until_ready(y)
    y_ref = x @ (log_weight ** 2).T
    np.testing.assert_allclose(np.asarray(y), np.asarray(y_ref),
                               rtol=1e-5, atol=1e-5)

    # Bias path
    log_weight_b, bias_b = init_positive_linear_params(
        k_p, in_features, out_features, use_bias=True)
    y_b = positive_linear(x, log_weight_b, bias_b)
    jax.block_until_ready(y_b)
    y_b_ref = x @ (log_weight_b ** 2).T + bias_b
    np.testing.assert_allclose(np.asarray(y_b), np.asarray(y_b_ref),
                               rtol=1e-5, atol=1e-5)

    # Higher-rank input (reshape path), reusing the small parameters.
    x3 = jax.random.normal(k_x3, (2, 4, in_features), dtype=jnp.float32)
    y3 = positive_linear(x3, log_weight_b, bias_b)
    jax.block_until_ready(y3)
    y3_ref = jnp.einsum("bti,oi->bto", x3, log_weight_b ** 2) + bias_b
    np.testing.assert_allclose(np.asarray(y3), np.asarray(y3_ref),
                               rtol=1e-5, atol=1e-5)

    # ---- Ragged shapes with default tiles: padding-aware single-K path ----
    B2, in2, out2 = 200, 1100, 300
    x2 = jax.random.normal(k_x2, (B2, in2), dtype=jnp.float32)
    log_weight2, bias2 = init_positive_linear_params(k_p2, in2, out2,
                                                     use_bias=True)
    y2 = positive_linear(x2, log_weight2, bias2)
    jax.block_until_ready(y2)
    y2_ref = x2 @ (log_weight2 ** 2).T + bias2
    np.testing.assert_allclose(np.asarray(y2), np.asarray(y2_ref),
                               rtol=1e-4, atol=1e-4)

    # ---- Same data with small explicit tiles: exercises the multi-K
    #      accumulator (pl.when init/finalize) and the tiled (M, N, K) grid ----
    y2_tiled = positive_linear(x2, log_weight2, bias2, tm=128, tn=128, tk=384)
    jax.block_until_ready(y2_tiled)
    np.testing.assert_allclose(np.asarray(y2_tiled), np.asarray(y2_ref),
                               rtol=1e-4, atol=1e-4)

    print("KERNEL_OK")
</pallas_src>

<mosaic_0001>
module attributes {stable_mosaic.version = 11 : i64} {
  func.func @kernel(%arg0: i32, %arg1: i32, %arg2: i32, %arg3: memref<8x128xf32, #tpu.memory_space<vmem>>, %arg4: memref<128x128xf32, #tpu.memory_space<vmem>>, %arg5: memref<8x128xf32, #tpu.memory_space<vmem>>) attributes {dimension_semantics = [#tpu.dimension_semantics<parallel>, #tpu.dimension_semantics<parallel>, #tpu.dimension_semantics<arbitrary>], iteration_bounds = array<i64: 1, 1, 1>, scalar_prefetch = 0 : i64, scratch_operands = 0 : i64, tpu.core_type = #tpu.core_type<tc>, window_params = [{transform_indices = @transform_0, window_bounds = array<i64: 8, 128>}, {transform_indices = @transform_1, window_bounds = array<i64: 128, 128>}, {transform_indices = @transform_2, window_bounds = array<i64: 8, 128>}]} {
    %c0 = arith.constant 0 : index
    %c0_0 = arith.constant 0 : index
    %0 = vector.load %arg4[%c0, %c0_0] : memref<128x128xf32, #tpu.memory_space<vmem>>, vector<128x128xf32>
    %1 = arith.mulf %0, %0 : vector<128x128xf32>
    %c0_1 = arith.constant 0 : index
    %c0_2 = arith.constant 0 : index
    %2 = vector.load %arg3[%c0_1, %c0_2] : memref<8x128xf32, #tpu.memory_space<vmem>>, vector<8x128xf32>
    %cst = arith.constant dense<0.000000e+00> : vector<8x128xf32>
    %3 = tpu.matmul %2, %1, %cst {dimension_numbers = #tpu.dot_dimension_numbers<[1], [1], [0], [0], [0, 0, 1, 0], [], []>} : vector<8x128xf32>, vector<128x128xf32>, vector<8x128xf32> -> vector<8x128xf32>
    %c0_3 = arith.constant 0 : index
    %c0_4 = arith.constant 0 : index
    %4 = vector.load %arg5[%c0_3, %c0_4] : memref<8x128xf32, #tpu.memory_space<vmem>>, vector<8x128xf32>
    tpu.vector_store %arg5[%c0_3, %c0_4], %3 {strides = array<i32>} : memref<8x128xf32, #tpu.memory_space<vmem>>, vector<8x128xf32>,
    return
  }
  func.func @transform_0(%arg0: i32, %arg1: i32, %arg2: i32) -> (i32, i32) {
    %c0_i32 = arith.constant 0 : i32
    return %arg0, %arg2 : i32, i32
  }
  func.func @transform_1(%arg0: i32, %arg1: i32, %arg2: i32) -> (i32, i32) {
    %c0_i32 = arith.constant 0 : i32
    return %arg1, %arg2 : i32, i32
  }
  func.func @transform_2(%arg0: i32, %arg1: i32, %arg2: i32) -> (i32, i32) {
    %c0_i32 = arith.constant 0 : i32
    return %arg0, %arg1 : i32, i32
  }
}

</mosaic_0001>

<bundles_post_ra>
// kernel: positive_linear.1
= control target key start
LH: loop header
LB: loop body
LE: loop exit
PB: predicated region body
PF: predicated region fallthrough
CT: control target
= control target key end

     0   :  { %s179_s0 = inlined_call_operand.vmem [shape: f32[8,128], index: 0, kind: input, shape index: {}]   ;;  %s180_s1 = inlined_call_operand.vmem [shape: f32[128,128], index: 1, kind: input, shape index: {}]   ;;  %s181_s2 = inlined_call_operand.hbm [shape: f32[8,128], index: 2, kind: output, shape index: {}]  }
   0x1   :  { %v27_v0 = vld [vmem:[%s180_s1 + $0x78] sm:$0xff]  ;;  %v26_v1 = vld [vmem:[%s180_s1 + $0x70] sm:$0xff] }
   0x2   :  { %v43_v2 = vmul.f32 %v27_v0, %v27_v0  ;;  %v42_v3 = vmul.f32 %v26_v1, %v26_v1 }
   0x4   :  { %45 = vmatpush.xpose.msra.mxu0 %v43_v2 }
   0x5   :  { %7 = vsyncpa [#allocation3], 0  ;;  %v25_v4 = vld [vmem:[%s180_s1 + $0x68] sm:$0xff]  ;;  %v24_v6 = vld [vmem:[%s180_s1 + $0x60] sm:$0xff]  ;;  %s109_s15 = smov [#allocation2]   ;;  %s73_s19 = sshll.u32 %s181_s2, 4  ;;  %s74_s19 = int_to_ptr.hbm [resolvable:$true] %s73_s19 }
   0x6   :  { %v41_v5 = vmul.f32 %v25_v4, %v25_v4  ;;  %v40_v7 = vmul.f32 %v24_v6, %v24_v6  ;;  %v23_v8 = vld [vmem:[%s180_s1 + $0x58] sm:$0xff]  ;;  %v22_v10 = vld [vmem:[%s180_s1 + $0x50] sm:$0xff]  ;;  %v21_v12 = vld [vmem:[%s180_s1 + $0x48] sm:$0xff]  ;;  %s71_s16 = sshll.u32 %s109_s15, 4  ;;  %s72_s16 = int_to_ptr.vmem [resolvable:$true] %s71_s16 }
   0x7   :  { %v39_v9 = vmul.f32 %v23_v8, %v23_v8  ;;  %v38_v11 = vmul.f32 %v22_v10, %v22_v10  ;;  %v37_v13 = vmul.f32 %v21_v12, %v21_v12  ;;  %v20_v14 = vld [vmem:[%s180_s1 + $0x40] sm:$0xff]  ;;  %v19_v16 = vld [vmem:[%s180_s1 + $0x38] sm:$0xff]  ;;  %v18_v18 = vld [vmem:[%s180_s1 + $0x30] sm:$0xff] }
   0x8   :  { %46 = vmatpush.xpose.msra.mxu0 %v42_v3  ;;  %v36_v15 = vmul.f32 %v20_v14, %v20_v14  ;;  %v35_v17 = vmul.f32 %v19_v16, %v19_v16  ;;  %v34_v19 = vmul.f32 %v18_v18, %v18_v18  ;;  %v17_v20 = vld [vmem:[%s180_s1 + $0x28] sm:$0xff]  ;;  %v16_v22 = vld [vmem:[%s180_s1 + $0x20] sm:$0xff]  ;;  %v15_v24 = vld [vmem:[%s180_s1 + $0x18] sm:$0xff] }
   0x9   :  { %v33_v21 = vmul.f32 %v17_v20, %v17_v20  ;;  %v32_v23 = vmul.f32 %v16_v22, %v16_v22  ;;  %v31_v25 = vmul.f32 %v15_v24, %v15_v24  ;;  %v14_v26 = vld [vmem:[%s180_s1 + $0x10] sm:$0xff]  ;;  %v13_v28 = vld [vmem:[%s180_s1 + $0x8] sm:$0xff]  ;;  %v12_v30 = vld [vmem:[%s180_s1] sm:$0xff] }
   0xa   :  { %v30_v27 = vmul.f32 %v14_v26, %v14_v26  ;;  %v29_v29 = vmul.f32 %v13_v28, %v13_v28  ;;  %v28_v31 = vmul.f32 %v12_v30, %v12_v30  ;;  %v44_v32 = vld [vmem:[%s179_s0] sm:$0xff] }
   0xc   :  { %47 = vmatpush.xpose.msra.mxu0 %v41_v5 }
  0x10   :  { %48 = vmatpush.xpose.msra.mxu0 %v40_v7 }
  0x14   :  { %49 = vmatpush.xpose.msra.mxu0 %v39_v9 }
  0x18   :  { %50 = vmatpush.xpose.msra.mxu0 %v38_v11 }
  0x1c   :  { %51 = vmatpush.xpose.msra.mxu0 %v37_v13 }
  0x20   :  { %52 = vmatpush.xpose.msra.mxu0 %v36_v15 }
  0x24   :  { %53 = vmatpush.xpose.msra.mxu0 %v35_v17 }
  0x28   :  { %54 = vmatpush.xpose.msra.mxu0 %v34_v19 }
  0x2c   :  { %55 = vmatpush.xpose.msra.mxu0 %v33_v21 }
  0x30   :  { %56 = vmatpush.xpose.msra.mxu0 %v32_v23 }
  0x34   :  { %57 = vmatpush.xpose.msra.mxu0 %v31_v25 }
  0x38   :  { %58 = vmatpush.xpose.msra.mxu0 %v30_v27 }
  0x3c   :  { %59 = vmatpush.xpose.msra.mxu0 %v29_v29 }
  0x40   :  { %60 = vmatpush.xpose.msra.mxu0 %v28_v31 }
  0x43   :  { %61 = vmatmul.f32.vlgmr.msra.gmra.mxu0 %v44_v32 }
  0xc0   :  { %v62_v33 = vpop.f32.mrf.mxu0 }
  0xc1   :  { %65 = vst [vmem:[#allocation2] sm:$0xff] %v62_v33 }
  0xc2   :  { %76 = dma.vmem_to_hbm [thread:$0]  %s72_s16, 128, %s74_s19, [#allocation3]  }
  0xc3   :  { %107 = dma.done.wait [#allocation3], 128  }
  0xc4   :  { %108 = vsyncadd [#allocation3], 4294967168 }
  0xc5   :  { %81 = vsyncpa [#allocation3], 1 }

</bundles_post_ra>
